<compile_context>
chip_gen: v7x
topology: tpu7x:2x2x1
jax: 0.10.0
libtpu: 0.0.40
codegen_flags: <defaults>
</compile_context>

<pallas_src>
import jax
import jax.numpy as jnp
from jax.experimental import pallas as pl
from jax.experimental.pallas import tpu as pltpu

NEG_SLOPE = 0.01  # nn.LeakyReLU() default


def _leaky_relu(x):
    return jnp.where(x > 0, x, NEG_SLOPE * x)


def fogpassfilter_kernel(x_ref, w1_ref, b1_ref, w2_ref, b2_ref, w3_ref, b3_ref, o_ref):
    # Weights arrive in the compute dtype (bf16). x arrives f32 and is cast
    # in-kernel; every dot accumulates in f32 on the MXU; biases are f32.
    cd = w1_ref.dtype
    x = x_ref[...].astype(cd)

    h = jnp.dot(x, w1_ref[...], preferred_element_type=jnp.float32)
    h = _leaky_relu(h + b1_ref[...])

    h = jnp.dot(h.astype(cd), w2_ref[...], preferred_element_type=jnp.float32)
    h = _leaky_relu(h + b2_ref[...])

    out = jnp.dot(h.astype(cd), w3_ref[...], preferred_element_type=jnp.float32)
    out = out + b3_ref[...]
    o_ref[...] = out.astype(o_ref.dtype)


def _num_tensorcores():
    """Best-effort TC count per device (v5e/v6e: 1, v7x: 2); never raises."""
    try:
        return max(1, int(getattr(jax.devices()[0], "num_cores", 1)))
    except Exception:
        return 1


def _auto_tile(batch):
    """Pick a batch tile that divides `batch` exactly (no padding launches).

    Single-TC chips -> one full block (grid=1, no per-step overhead).
    Multi-TC chips  -> a few steps per core so input/output DMAs pipeline,
    but only when the resulting tile keeps the (8, ...) sublane constraint.
    """
    cores = _num_tensorcores()
    if cores > 1:
        for steps in (cores * 4, cores * 2, cores):
            if batch % steps == 0 and (batch // steps) % 8 == 0 and batch // steps >= 8:
                return batch // steps
    return batch


def fogpassfilter_conv1(x, params, *, batch_tile=None, out_dtype=jnp.float32):
    """params: dict with w1,b1,w2,b2,w3,b3. wN shaped (in,out) bf16, bN shaped (1,out) f32."""
    B, D = x.shape
    w1, b1 = params["w1"], params["b1"]
    w2, b2 = params["w2"], params["b2"]
    w3, b3 = params["w3"], params["b3"]
    H1, H2, O = w1.shape[1], w2.shape[1], w3.shape[1]

    tile = batch_tile
    if tile is None or tile <= 0 or B % tile != 0 or (tile != B and tile % 8 != 0):
        tile = _auto_tile(B)
    grid = (B // tile,)

    flops = 2 * B * (D * H1 + H1 * H2 + H2 * O)
    bytes_accessed = (
        x.size * x.dtype.itemsize
        + sum(a.size * a.dtype.itemsize for a in (w1, b1, w2, b2, w3, b3))
        + B * O * jnp.dtype(out_dtype).itemsize
    )

    return pl.pallas_call(
        fogpassfilter_kernel,
        out_shape=jax.ShapeDtypeStruct((B, O), out_dtype),
        grid_spec=pltpu.PrefetchScalarGridSpec(
            num_scalar_prefetch=0,
            grid=grid,
            in_specs=[
                pl.BlockSpec((tile, D), lambda i: (i, 0)),  # x tile (f32)
                pl.BlockSpec((D, H1), lambda i: (0, 0)),    # w1 (resident)
                pl.BlockSpec((1, H1), lambda i: (0, 0)),    # b1
                pl.BlockSpec((H1, H2), lambda i: (0, 0)),   # w2
                pl.BlockSpec((1, H2), lambda i: (0, 0)),    # b2
                pl.BlockSpec((H2, O), lambda i: (0, 0)),    # w3
                pl.BlockSpec((1, O), lambda i: (0, 0)),     # b3
            ],
            out_specs=pl.BlockSpec((tile, O), lambda i: (i, 0)),
        ),
        compiler_params=pltpu.CompilerParams(
            dimension_semantics=("parallel",),
        ),
        cost_estimate=pl.CostEstimate(
            flops=flops, transcendentals=0, bytes_accessed=bytes_accessed
        ),
    )(x, w1, b1, w2, b2, w3, b3)


def init_params(key, inputsize, compute_dtype=jnp.bfloat16):
    """Deterministic init matching nn.Linear shapes (stored transposed).

    Weights are pre-cast once to the MXU compute dtype here (not per call);
    biases stay f32 and are added after f32 accumulation.
    Note: approximation of torch's Kaiming-uniform (1/sqrt(fan_in) bound for
    both w and b) — fine for a kernel test, not for weight porting.
    """
    h1 = inputsize // 2
    h2 = inputsize // 4
    out = 64
    ks = jax.random.split(key, 6)

    def linear(kw, kb, fan_in, fan_out):
        bound = 1.0 / jnp.sqrt(fan_in)
        w = jax.random.uniform(kw, (fan_in, fan_out), jnp.float32, -bound, bound)
        b = jax.random.uniform(kb, (1, fan_out), jnp.float32, -bound, bound)
        return w.astype(compute_dtype), b.astype(jnp.float32)

    w1, b1 = linear(ks[0], ks[1], inputsize, h1)
    w2, b2 = linear(ks[2], ks[3], h1, h2)
    w3, b3 = linear(ks[4], ks[5], h2, out)
    return {"w1": w1, "b1": b1, "w2": w2, "b2": b2, "w3": w3, "b3": b3}


def reference(x, p):
    """Pure-JAX reference mirroring the kernel's precision (bf16 in, f32 acc)."""
    cd = p["w1"].dtype
    h = jnp.dot(x.astype(cd), p["w1"], preferred_element_type=jnp.float32) + p["b1"]
    h = _leaky_relu(h)
    h = jnp.dot(h.astype(cd), p["w2"], preferred_element_type=jnp.float32) + p["b2"]
    h = _leaky_relu(h)
    return jnp.dot(h.astype(cd), p["w3"], preferred_element_type=jnp.float32) + p["b3"]


if __name__ == "__main__":
    key = jax.random.PRNGKey(0)
    inputsize = 64   # -> hidden 32, hidden2 16, output 64 (small test shapes)
    batch = 16

    k_x, k_p = jax.random.split(key)
    x = jax.random.normal(k_x, (batch, inputsize), dtype=jnp.float32)
    params = init_params(k_p, inputsize)

    # One jit around the whole forward so nothing extra surrounds the pallas_call.
    fwd = jax.jit(fogpassfilter_conv1)
    out = jax.block_until_ready(fwd(x, params))
    assert out.shape == (batch, 64), out.shape

    ref = reference(x, params)
    max_err = float(jnp.max(jnp.abs(out - ref)))
    assert jnp.allclose(out, ref, atol=2e-2, rtol=2e-2), (
        f"mismatch vs JAX reference (max abs err {max_err})"
    )

    print("KERNEL_OK")
</pallas_src>

<mosaic_0001>
module attributes {stable_mosaic.version = 11 : i64} {
  func.func @fogpassfilter_kernel(%arg0: i32, %arg1: memref<16x64xf32, #tpu.memory_space<vmem>>, %arg2: memref<64x32xbf16, #tpu.memory_space<vmem>>, %arg3: memref<1x32xf32, #tpu.memory_space<vmem>>, %arg4: memref<32x16xbf16, #tpu.memory_space<vmem>>, %arg5: memref<1x16xf32, #tpu.memory_space<vmem>>, %arg6: memref<16x64xbf16, #tpu.memory_space<vmem>>, %arg7: memref<1x64xf32, #tpu.memory_space<vmem>>, %arg8: memref<16x64xf32, #tpu.memory_space<vmem>>) attributes {dimension_semantics = [#tpu.dimension_semantics<parallel>], iteration_bounds = array<i64: 1>, scalar_prefetch = 0 : i64, scratch_operands = 0 : i64, tpu.core_type = #tpu.core_type<tc>, window_params = [{transform_indices = @transform_0, window_bounds = array<i64: 16, 64>}, {pipeline_mode = #tpu.pipeline_mode<synchronous>, transform_indices = @transform_1, window_bounds = array<i64: 64, 32>}, {pipeline_mode = #tpu.pipeline_mode<synchronous>, transform_indices = @transform_2, window_bounds = array<i64: 1, 32>}, {pipeline_mode = #tpu.pipeline_mode<synchronous>, transform_indices = @transform_3, window_bounds = array<i64: 32, 16>}, {pipeline_mode = #tpu.pipeline_mode<synchronous>, transform_indices = @transform_4, window_bounds = array<i64: 1, 16>}, {pipeline_mode = #tpu.pipeline_mode<synchronous>, transform_indices = @transform_5, window_bounds = array<i64: 16, 64>}, {pipeline_mode = #tpu.pipeline_mode<synchronous>, transform_indices = @transform_6, window_bounds = array<i64: 1, 64>}, {transform_indices = @transform_7, window_bounds = array<i64: 16, 64>}]} {
    %c0 = arith.constant 0 : index
    %c0_0 = arith.constant 0 : index
    %0 = vector.load %arg1[%c0, %c0_0] : memref<16x64xf32, #tpu.memory_space<vmem>>, vector<16x64xf32>
    %1 = arith.truncf %0 : vector<16x64xf32> to vector<16x64xbf16>
    %c0_1 = arith.constant 0 : index
    %c0_2 = arith.constant 0 : index
    %2 = vector.load %arg2[%c0_1, %c0_2] : memref<64x32xbf16, #tpu.memory_space<vmem>>, vector<64x32xbf16>
    %cst = arith.constant dense<0.000000e+00> : vector<16x32xf32>
    %3 = tpu.matmul %1, %2, %cst {dimension_numbers = #tpu.dot_dimension_numbers<[1], [0], [0], [1], [0, 0, 1, 1], [], []>} : vector<16x64xbf16>, vector<64x32xbf16>, vector<16x32xf32> -> vector<16x32xf32>
    %c0_3 = arith.constant 0 : index
    %c0_4 = arith.constant 0 : index
    %4 = vector.load %arg3[%c0_3, %c0_4] : memref<1x32xf32, #tpu.memory_space<vmem>>, vector<1x32xf32>
    %5 = vector.broadcast %4 : vector<1x32xf32> to vector<16x32xf32>
    %6 = arith.addf %3, %5 : vector<16x32xf32>
    %cst_5 = arith.constant 0.000000e+00 : f32
    %7 = vector.broadcast %cst_5 : f32 to vector<16x32xf32>
    %8 = arith.cmpf ogt, %6, %7 : vector<16x32xf32>
    %cst_6 = arith.constant 0.00999999977 : f32
    %9 = vector.broadcast %cst_6 : f32 to vector<16x32xf32>
    %10 = arith.mulf %9, %6 : vector<16x32xf32>
    %11 = arith.select %8, %6, %10 : vector<16x32xi1>, vector<16x32xf32>
    %12 = arith.truncf %11 : vector<16x32xf32> to vector<16x32xbf16>
    %c0_7 = arith.constant 0 : index
    %c0_8 = arith.constant 0 : index
    %13 = vector.load %arg4[%c0_7, %c0_8] : memref<32x16xbf16, #tpu.memory_space<vmem>>, vector<32x16xbf16>
    %cst_9 = arith.constant dense<0.000000e+00> : vector<16x16xf32>
    %14 = tpu.matmul %12, %13, %cst_9 {dimension_numbers = #tpu.dot_dimension_numbers<[1], [0], [0], [1], [0, 0, 1, 1], [], []>} : vector<16x32xbf16>, vector<32x16xbf16>, vector<16x16xf32> -> vector<16x16xf32>
    %c0_10 = arith.constant 0 : index
    %c0_11 = arith.constant 0 : index
    %15 = vector.load %arg5[%c0_10, %c0_11] : memref<1x16xf32, #tpu.memory_space<vmem>>, vector<1x16xf32>
    %16 = vector.broadcast %15 : vector<1x16xf32> to vector<16x16xf32>
    %17 = arith.addf %14, %16 : vector<16x16xf32>
    %cst_12 = arith.constant 0.000000e+00 : f32
    %18 = vector.broadcast %cst_12 : f32 to vector<16x16xf32>
    %19 = arith.cmpf ogt, %17, %18 : vector<16x16xf32>
    %cst_13 = arith.constant 0.00999999977 : f32
    %20 = vector.broadcast %cst_13 : f32 to vector<16x16xf32>
    %21 = arith.mulf %20, %17 : vector<16x16xf32>
    %22 = arith.select %19, %17, %21 : vector<16x16xi1>, vector<16x16xf32>
    %23 = arith.truncf %22 : vector<16x16xf32> to vector<16x16xbf16>
    %c0_14 = arith.constant 0 : index
    %c0_15 = arith.constant 0 : index
    %24 = vector.load %arg6[%c0_14, %c0_15] : memref<16x64xbf16, #tpu.memory_space<vmem>>, vector<16x64xbf16>
    %cst_16 = arith.constant dense<0.000000e+00> : vector<16x64xf32>
    %25 = tpu.matmul %23, %24, %cst_16 {dimension_numbers = #tpu.dot_dimension_numbers<[1], [0], [0], [1], [0, 0, 1, 1], [], []>} : vector<16x16xbf16>, vector<16x64xbf16>, vector<16x64xf32> -> vector<16x64xf32>
    %c0_17 = arith.constant 0 : index
    %c0_18 = arith.constant 0 : index
    %26 = vector.load %arg7[%c0_17, %c0_18] : memref<1x64xf32, #tpu.memory_space<vmem>>, vector<1x64xf32>
    %27 = vector.broadcast %26 : vector<1x64xf32> to vector<16x64xf32>
    %28 = arith.addf %25, %27 : vector<16x64xf32>
    %c0_19 = arith.constant 0 : index
    %c0_20 = arith.constant 0 : index
    %29 = vector.load %arg8[%c0_19, %c0_20] : memref<16x64xf32, #tpu.memory_space<vmem>>, vector<16x64xf32>
    tpu.vector_store %arg8[%c0_19, %c0_20], %28 {strides = array<i32>} : memref<16x64xf32, #tpu.memory_space<vmem>>, vector<16x64xf32>,
    return
  }
  func.func @transform_0(%arg0: i32) -> (i32, i32) {
    %c0_i32 = arith.constant 0 : i32
    %c0_i32_0 = arith.constant 0 : i32
    return %arg0, %c0_i32 : i32, i32
  }
  func.func @transform_1(%arg0: i32) -> (i32, i32) {
    %c0_i32 = arith.constant 0 : i32
    %c0_i32_0 = arith.constant 0 : i32
    %c0_i32_1 = arith.constant 0 : i32
    return %c0_i32, %c0_i32_0 : i32, i32
  }
  func.func @transform_2(%arg0: i32) -> (i32, i32) {
    %c0_i32 = arith.constant 0 : i32
    %c0_i32_0 = arith.constant 0 : i32
    %c0_i32_1 = arith.constant 0 : i32
    return %c0_i32, %c0_i32_0 : i32, i32
  }
  func.func @transform_3(%arg0: i32) -> (i32, i32) {
    %c0_i32 = arith.constant 0 : i32
    %c0_i32_0 = arith.constant 0 : i32
    %c0_i32_1 = arith.constant 0 : i32
    return %c0_i32, %c0_i32_0 : i32, i32
  }
  func.func @transform_4(%arg0: i32) -> (i32, i32) {
    %c0_i32 = arith.constant 0 : i32
    %c0_i32_0 = arith.constant 0 : i32
    %c0_i32_1 = arith.constant 0 : i32
    return %c0_i32, %c0_i32_0 : i32, i32
  }
  func.func @transform_5(%arg0: i32) -> (i32, i32) {
    %c0_i32 = arith.constant 0 : i32
    %c0_i32_0 = arith.constant 0 : i32
    %c0_i32_1 = arith.constant 0 : i32
    return %c0_i32, %c0_i32_0 : i32, i32
  }
  func.func @transform_6(%arg0: i32) -> (i32, i32) {
    %c0_i32 = arith.constant 0 : i32
    %c0_i32_0 = arith.constant 0 : i32
    %c0_i32_1 = arith.constant 0 : i32
    return %c0_i32, %c0_i32_0 : i32, i32
  }
  func.func @transform_7(%arg0: i32) -> (i32, i32) {
    %c0_i32 = arith.constant 0 : i32
    %c0_i32_0 = arith.constant 0 : i32
    return %arg0, %c0_i32 : i32, i32
  }
}

</mosaic_0001>

<bundles_post_ra>
// kernel: fogpassfilter_conv1.1
= control target key start
LH: loop header
LB: loop body
LE: loop exit
PB: predicated region body
PF: predicated region fallthrough
CT: control target
= control target key end

     0   :  { %v360_v1 = vmov 0.0   ;;  %vm361_vm0 = vmmov 0   ;;  %s459_s0 = inlined_call_operand.vmem [shape: f32[16,64], index: 0, kind: input, shape index: {}]   ;;  %s460_s1 = inlined_call_operand.vmem [shape: bf16[64,32], index: 1, kind: input, shape index: {}]   ;;  %s461_s2 = inlined_call_operand.vmem [shape: f32[1,32], index: 2, kind: input, shape index: {}]   ;;  %s462_s3 = inlined_call_operand.vmem [shape: bf16[32,16], index: 3, kind: input, shape index: {}]   ;;  %s463_s4 = inlined_call_operand.vmem [shape: f32[1,16], index: 4, kind: input, shape index: {}]   ;;  %s464_s5 = inlined_call_operand.vmem [shape: bf16[16,64], index: 5, kind: input, shape index: {}]   ;;  %s465_s6 = inlined_call_operand.vmem [shape: f32[1,64], index: 6, kind: input, shape index: {}]   ;;  %s466_s7 = inlined_call_operand.hbm [shape: f32[16,64], index: 7, kind: output, shape index: {}]  }
   0x1   :  { %v329_v0 = vld [vmem:[%s460_s1] sm:$0xff]   ;;  %298 = vmatprep.subr.bf16.mxu0 %v360_v1  ;;  %310 = vmatprep.subr.bf16.mxu1 %v360_v1  ;;  %v330_v2 = vld [vmem:[%s460_s1 + $0x8] sm:$0xff]   ;;  %v331_v3 = vld [vmem:[%s460_s1 + $0x10] sm:$0xff]  }
   0x2   :  { %299 = vmatpush3.bf16.msra.mxu0 %v329_v0  ;;  %306 = vmatprep.mubr.msk.bf16.mxu0 %vm361_vm0, %v360_v1 }
   0x3   :  { %300 = vmatprep.subr.bf16.mxu0 %v360_v1  ;;  %314 = vmatprep.mubr.msk.bf16.mxu1 %vm361_vm0, %v360_v1 }
   0x6   :  { %301 = vmatpush3.bf16.msra.mxu0 %v330_v2 }
   0x7   :  { %302 = vmatprep.subr.bf16.mxu0 %v360_v1 }
   0x8   :  { %12 = vsyncpa [#allocation3], 0  ;;  %v332_v4 = vld [vmem:[%s460_s1 + $0x18] sm:$0xff]   ;;  %v28_v5 = vld [vmem:[%s459_s0] sm:$0xff]  ;;  %vm70_vm1 = vcmask 523264   ;;  %vm145_vm4 = vcmask 261120  }
   0x9   :  { %v29_v6 = vld [vmem:[%s459_s0 + $0x8] sm:$0xff]  ;;  %v333_v8 = vld [vmem:[%s462_s3] sm:$0xff]   ;;  %vm212_vm7 = vcmask 130048  }
   0xa   :  { %303 = vmatpush3.bf16.msra.mxu0 %v331_v3  ;;  %v30_v7 = vpack.c.bf16 %v29_v6, %v28_v5  ;;  %311 = vmatpush3.bf16.msra.mxu1 %v333_v8  ;;  %v334_v9 = vld [vmem:[%s462_s3 + $0x8] sm:$0xff]   ;;  %v275_v10 = vld [vmem:[%s461_s2] ss:$0 sm:$0xff] }
   0xb   :  { %304 = vmatprep.subr.bf16.mxu0 %v360_v1  ;;  %312 = vmatprep.subr.bf16.mxu1 %v360_v1  ;;  %v335_v22 = vld [vmem:[%s464_s5] sm:$0xff]  }
   0xc   :  { %v281_v23 = vld [vmem:[%s463_s4] ss:$0 sm:$0xff]  ;;  %s362_s4 = smov [#allocation2]  }
   0xd   :  { %v285_v35 = vld [vmem:[%s465_s6] ss:$0 sm:$0xff]  ;;  %s264_s20 = sshll.u32 %s362_s4, 4  ;;  %s265_s20 = int_to_ptr.vmem [resolvable:$true] %s264_s20 }
   0xe   :  { %305 = vmatpush3.bf16.msra.mxu0 %v332_v4  ;;  %313 = vmatpush3.bf16.msra.mxu1 %v334_v9  ;;  %s336_s21 = scalar_lea.vmem %s265_s20, 256  ;;  %p341_p1 = scmp.lt.s32.totalorder %s265_s20, %s265_s20 }
   0xf   :  { %318 = vmatprep.subr.bf16.mxu1 %v360_v1  ;;  %p337_p0 = scmp.ne.s32.totalorder %s265_s20, %s336_s21  ;;  %p342_p2 = scmp.lt.s32.totalorder %s336_s21, %s336_s21 }
  0x11   :  { %307 = vmatmul.mubr.msk.bf16.vlgmr.msra.gmra.mrb[0].mxu0 %vm70_vm1, %v30_v7  ;;  %p343_p3 = por %p342_p2, %p341_p1 }
  0x13   :  { %p344_p4 = pnand %p343_p3, %p337_p0 }
  0xe4   :  { %v108_v11 = vpop.f32.mrb[0].mxu0 }
  0xe5   :  { %v109_v12 = vadd.f32 %v275_v10, %v108_v11  ;;  %v308_v13 = vpop.f32.mrb[1].mxu0 }
  0xe6   :  { %v111_v14 = vpop.f32.mrb[2].mxu0 }
  0xe7   :  { %v117_v15 = vmul.f32 0.01, %v109_v12  ;;  %v112_v16 = vadd.f32 %v275_v10, %v111_v14  ;;  %v309_v17 = vpop.f32.mrb[3].mxu0  ;;  %vm115_vm2 = vcmp.gt.f32.partialorder %v109_v12, 0.0 }
  0xe9   :  { %vm116_vm3 = vcmp.gt.f32.partialorder %v112_v16, 0.0  ;;  %v118_v18 = vmul.f32 0.01, %v112_v16  ;;  %v119_v19 = vsel %vm115_vm2, %v109_v12, %v117_v15 }
  0xeb   :  { %v120_v20 = vsel %vm116_vm3, %v112_v16, %v118_v18 }
  0xec   :  { %v121_v21 = vpack.c.bf16 %v120_v20, %v119_v19 }
  0xee   :  { %315 = vmatmul.mubr.msk.bf16.vlgmr.msra.gmra.mrb[0].mxu1 %vm145_vm4, %v121_v21 }
  0xef   :  { %320 = vmatprep.mubr.msk.bf16.mxu1 %vm361_vm0, %v360_v1  ;;  %319 = vmatpush3.bf16.msra.mxu1 %v335_v22 }
 0x1c1   :  { %v183_v24 = vpop.f32.mrb[0].mxu1 }
 0x1c2   :  { %v184_v25 = vadd.f32 %v281_v23, %v183_v24  ;;  %v316_v26 = vpop.f32.mrb[1].mxu1 }
 0x1c3   :  { %v186_v27 = vpop.f32.mrb[2].mxu1 }
 0x1c4   :  { %v192_v28 = vmul.f32 0.01, %v184_v25  ;;  %v187_v29 = vadd.f32 %v281_v23, %v186_v27  ;;  %v317_v30 = vpop.f32.mrb[3].mxu1  ;;  %vm190_vm5 = vcmp.gt.f32.partialorder %v184_v25, 0.0 }
 0x1c6   :  { %vm191_vm6 = vcmp.gt.f32.partialorder %v187_v29, 0.0  ;;  %v193_v31 = vmul.f32 0.01, %v187_v29  ;;  %v194_v32 = vsel %vm190_vm5, %v184_v25, %v192_v28 }
 0x1c8   :  { %v195_v33 = vsel %vm191_vm6, %v187_v29, %v193_v31 }
 0x1c9   :  { %v196_v34 = vpack.c.bf16 %v195_v33, %v194_v32 }
 0x1cb   :  { %321 = vmatmul.mubr.msk.bf16.vlgmr.msra.gmra.mrb[4].mxu1 %vm212_vm7, %v196_v34 }
 0x29e   :  { %v250_v36 = vpop.f32.mrb[4].mxu1 }
 0x29f   :  { %v251_v37 = vadd.f32 %v285_v35, %v250_v36  ;;  %v322_v38 = vpop.f32.mrb[5].mxu1 }
 0x2a0   :  { %v253_v39 = vpop.f32.mrb[6].mxu1 }
 0x2a1   :  { %257 = vst.msk [vmem:[#allocation2] sm:$0xff] %vm70_vm1, %v251_v37  ;;  %v254_v40 = vadd.f32 %v285_v35, %v253_v39  ;;  %v323_v41 = vpop.f32.mrb[7].mxu1 }
 0x2a3   :  { %258 = vst.msk [vmem:[#allocation2 + $0x8] sm:$0xff] %vm70_vm1, %v254_v40 }
 0x2a4   :  { %347 = shalt.err (!%p344_p4)
}
 0x2a5   :  { %s348_s23 = scalar_lea.hbm %s466_s7, 256 }
 0x2a6   :  { %p349_p5 = scmp.ne.s32.totalorder %s466_s7, %s348_s23  ;;  %p352_p6 = scmp.lt.u32.totalorder %s348_s23, %s466_s7 }
 0x2a8   :  { %p354_p7 = pnand %p352_p6, %p349_p5 }
 0x2aa   :  { %357 = shalt.err (!%p354_p7)
}
 0x2ab   :  { %s363_s28 = smov 128   ;;  %s364_s29 = smov 8  }
 0x2ac   :  { %270 = dma.vmem_to_hbm [thread:$0]  %s265_s20, 256, %s466_s7, [#allocation3], %s363_s28, %s363_s28, %s364_s29  }
 0x2ad   :  { %358 = dma.done.wait [#allocation3], 256  }
 0x2ae   :  { %359 = vsyncadd [#allocation3], 4294967040 }
 0x2af   :  { %274 = vsyncpa [#allocation3], 1 }

</bundles_post_ra>
